<compile_context>
chip_gen: v6e
topology: v6e:2x2x1
jax: 0.10.0
libtpu: 0.0.40
codegen_flags: <defaults>
</compile_context>

<pallas_src>
import functools

import jax
import jax.numpy as jnp
from jax.experimental import pallas as pl
from jax.experimental.pallas import tpu as pltpu


_LANE = 128                       # lane-dense last dim
_ROW_TILE = 2048                  # rows per block -> 2048*128*4B = 1 MiB f32
_SMALL_BYTES = 2 * 1024 * 1024    # below this, use the single-step path


def _wlp_tiled_kernel(w_ref, layers_ref, out_ref):
    """grid = (row_tiles, n_layers); layer axis (last) is the reduction axis.

    out_ref's index_map is constant in the layer axis, so the output block is
    resident in VMEM across the reduction and is used as the accumulator.
    Weights are pre-normalized in the wrapper, so there is no final divide.
    """
    l = pl.program_id(1)

    @pl.when(l == 0)
    def _():
        out_ref[...] = jnp.zeros_like(out_ref)

    out_ref[...] += w_ref[l] * layers_ref[0].astype(jnp.float32)


def _wlp_small_kernel(n_layers, w_ref, layers_ref, out_ref):
    """Single-invocation path for small tensors (no grid-step overhead)."""
    acc = w_ref[0] * layers_ref[0].astype(jnp.float32)
    for l in range(1, n_layers):           # n_layers is small & static: unroll
        acc = acc + w_ref[l] * layers_ref[l].astype(jnp.float32)
    out_ref[...] = acc


def weighted_layer_pooling(ft_all_layers, layer_weights, layer_start=4):
    """ft_all_layers: list of (B, S, H) arrays, length num_hidden_layers+1."""
    # Stack only the layers we actually use (less wrapper-side HBM traffic).
    used = list(ft_all_layers)[layer_start:]
    emb = jnp.stack(used)                              # (L, B, S, H)
    L, B, S, H = emb.shape
    assert layer_weights.shape == (L,)

    # Pre-normalize the tiny weight vector outside the kernel.
    w32 = layer_weights.astype(jnp.float32)
    w = w32 / jnp.sum(w32)

    # Flatten to a lane-dense 2D slab: (L, R, 128); zero-pad the element axis
    # if needed (zeros contribute nothing to the weighted sum).
    n = B * S * H
    r = -(-n // _LANE)                                 # ceil(n / 128)
    flat = emb.reshape(L, n)
    if r * _LANE != n:
        flat = jnp.pad(flat, ((0, 0), (0, r * _LANE - n)))
    flat = flat.reshape(L, r, _LANE)

    total_bytes = L * r * _LANE * flat.dtype.itemsize

    if total_bytes <= _SMALL_BYTES:
        # Whole problem fits comfortably in VMEM: one kernel invocation.
        out2d = pl.pallas_call(
            functools.partial(_wlp_small_kernel, L),
            out_shape=jax.ShapeDtypeStruct((r, _LANE), jnp.float32),
            in_specs=[
                pl.BlockSpec(memory_space=pltpu.MemorySpace.SMEM),   # weights
                pl.BlockSpec(memory_space=pltpu.MemorySpace.VMEM),   # layers
            ],
            out_specs=pl.BlockSpec(memory_space=pltpu.MemorySpace.VMEM),
        )(w, flat)
    else:
        # Spatially tiled, layer axis as the (last) reduction axis.
        if r <= _ROW_TILE:
            tm, rp = r, r
        else:
            tm = _ROW_TILE
            rp = (-(-r // tm)) * tm
            if rp != r:
                flat = jnp.pad(flat, ((0, 0), (0, rp - r), (0, 0)))
        num_row_tiles = rp // tm

        out2d = pl.pallas_call(
            _wlp_tiled_kernel,
            out_shape=jax.ShapeDtypeStruct((rp, _LANE), jnp.float32),
            grid_spec=pltpu.PrefetchScalarGridSpec(
                num_scalar_prefetch=0,
                grid=(num_row_tiles, L),
                in_specs=[
                    # Small weight vector lives in SMEM (scalar reads).
                    pl.BlockSpec(memory_space=pltpu.MemorySpace.SMEM),
                    # One (layer, row-tile) block per grid step, lane-dense.
                    pl.BlockSpec((1, tm, _LANE), lambda rt, l: (l, rt, 0)),
                ],
                # Constant in l -> resident accumulator across the reduction.
                out_specs=pl.BlockSpec((tm, _LANE), lambda rt, l: (rt, 0)),
            ),
            compiler_params=pltpu.CompilerParams(
                dimension_semantics=("parallel", "arbitrary")),
        )(w, flat)

    # Un-flatten (and drop any zero padding).
    return out2d.reshape(-1)[:n].reshape(B, S, H)


def reference(ft_all_layers, layer_weights, layer_start=4):
    emb = jnp.stack(ft_all_layers)[layer_start:]
    wf = layer_weights.reshape(-1, 1, 1, 1)
    return (wf * emb).sum(axis=0) / layer_weights.sum()


if __name__ == "__main__":
    num_hidden_layers = 12
    layer_start = 4
    key = jax.random.PRNGKey(0)

    def run_case(B, S, H):
        keys = jax.random.split(
            jax.random.fold_in(key, B * 100003 + S * 101 + H),
            num_hidden_layers + 1)
        ft_all_layers = [
            jax.random.normal(k, (B, S, H), dtype=jnp.float32) for k in keys
        ]
        # Deterministic parameter init, same as the module: all-ones weights.
        layer_weights = jnp.ones(
            (num_hidden_layers + 1 - layer_start,), dtype=jnp.float32)

        out = jax.block_until_ready(
            weighted_layer_pooling(ft_all_layers, layer_weights, layer_start))
        ref = reference(ft_all_layers, layer_weights, layer_start)
        assert out.shape == (B, S, H)
        assert jnp.allclose(out, ref, atol=1e-5, rtol=1e-5), (B, S, H)

    # Small demo shape (single-step kernel path, no padding).
    run_case(2, 8, 32)
    # Odd shape exercising lane padding (single-step path).
    run_case(1, 7, 100)
    # Larger shape exercising the tiled multi-row-tile reduction path.
    run_case(2, 256, 1024)

    print("KERNEL_OK")
</pallas_src>

<mosaic_0001>
module attributes {stable_mosaic.version = 11 : i64} {
  func.func @_wlp_small_kernel(%arg0: memref<9xf32, #tpu.memory_space<smem>>, %arg1: memref<9x4x128xf32, #tpu.memory_space<vmem>>, %arg2: memref<4x128xf32, #tpu.memory_space<vmem>>) attributes {dimension_semantics = [], scalar_prefetch = 0 : i64, scratch_operands = 0 : i64, tpu.core_type = #tpu.core_type<tc>} {
    %c0 = arith.constant 0 : index
    %0 = memref.load %arg0[%c0] : memref<9xf32, #tpu.memory_space<smem>>
    %c0_0 = arith.constant 0 : index
    %c0_1 = arith.constant 0 : index
    %c0_2 = arith.constant 0 : index
    %1 = vector.load %arg1[%c0_0, %c0_1, %c0_2] : memref<9x4x128xf32, #tpu.memory_space<vmem>>, vector<1x4x128xf32>
    %2 = vector.shape_cast %1 : vector<1x4x128xf32> to vector<4x128xf32>
    %3 = vector.broadcast %0 : f32 to vector<4x128xf32>
    %4 = arith.mulf %3, %2 : vector<4x128xf32>
    %c1 = arith.constant 1 : index
    %5 = memref.load %arg0[%c1] : memref<9xf32, #tpu.memory_space<smem>>
    %c1_3 = arith.constant 1 : index
    %c0_4 = arith.constant 0 : index
    %c0_5 = arith.constant 0 : index
    %6 = vector.load %arg1[%c1_3, %c0_4, %c0_5] : memref<9x4x128xf32, #tpu.memory_space<vmem>>, vector<1x4x128xf32>
    %7 = vector.shape_cast %6 : vector<1x4x128xf32> to vector<4x128xf32>
    %8 = vector.broadcast %5 : f32 to vector<4x128xf32>
    %9 = arith.mulf %8, %7 : vector<4x128xf32>
    %10 = arith.addf %4, %9 : vector<4x128xf32>
    %c2 = arith.constant 2 : index
    %11 = memref.load %arg0[%c2] : memref<9xf32, #tpu.memory_space<smem>>
    %c2_6 = arith.constant 2 : index
    %c0_7 = arith.constant 0 : index
    %c0_8 = arith.constant 0 : index
    %12 = vector.load %arg1[%c2_6, %c0_7, %c0_8] : memref<9x4x128xf32, #tpu.memory_space<vmem>>, vector<1x4x128xf32>
    %13 = vector.shape_cast %12 : vector<1x4x128xf32> to vector<4x128xf32>
    %14 = vector.broadcast %11 : f32 to vector<4x128xf32>
    %15 = arith.mulf %14, %13 : vector<4x128xf32>
    %16 = arith.addf %10, %15 : vector<4x128xf32>
    %c3 = arith.constant 3 : index
    %17 = memref.load %arg0[%c3] : memref<9xf32, #tpu.memory_space<smem>>
    %c3_9 = arith.constant 3 : index
    %c0_10 = arith.constant 0 : index
    %c0_11 = arith.constant 0 : index
    %18 = vector.load %arg1[%c3_9, %c0_10, %c0_11] : memref<9x4x128xf32, #tpu.memory_space<vmem>>, vector<1x4x128xf32>
    %19 = vector.shape_cast %18 : vector<1x4x128xf32> to vector<4x128xf32>
    %20 = vector.broadcast %17 : f32 to vector<4x128xf32>
    %21 = arith.mulf %20, %19 : vector<4x128xf32>
    %22 = arith.addf %16, %21 : vector<4x128xf32>
    %c4 = arith.constant 4 : index
    %23 = memref.load %arg0[%c4] : memref<9xf32, #tpu.memory_space<smem>>
    %c4_12 = arith.constant 4 : index
    %c0_13 = arith.constant 0 : index
    %c0_14 = arith.constant 0 : index
    %24 = vector.load %arg1[%c4_12, %c0_13, %c0_14] : memref<9x4x128xf32, #tpu.memory_space<vmem>>, vector<1x4x128xf32>
    %25 = vector.shape_cast %24 : vector<1x4x128xf32> to vector<4x128xf32>
    %26 = vector.broadcast %23 : f32 to vector<4x128xf32>
    %27 = arith.mulf %26, %25 : vector<4x128xf32>
    %28 = arith.addf %22, %27 : vector<4x128xf32>
    %c5 = arith.constant 5 : index
    %29 = memref.load %arg0[%c5] : memref<9xf32, #tpu.memory_space<smem>>
    %c5_15 = arith.constant 5 : index
    %c0_16 = arith.constant 0 : index
    %c0_17 = arith.constant 0 : index
    %30 = vector.load %arg1[%c5_15, %c0_16, %c0_17] : memref<9x4x128xf32, #tpu.memory_space<vmem>>, vector<1x4x128xf32>
    %31 = vector.shape_cast %30 : vector<1x4x128xf32> to vector<4x128xf32>
    %32 = vector.broadcast %29 : f32 to vector<4x128xf32>
    %33 = arith.mulf %32, %31 : vector<4x128xf32>
    %34 = arith.addf %28, %33 : vector<4x128xf32>
    %c6 = arith.constant 6 : index
    %35 = memref.load %arg0[%c6] : memref<9xf32, #tpu.memory_space<smem>>
    %c6_18 = arith.constant 6 : index
    %c0_19 = arith.constant 0 : index
    %c0_20 = arith.constant 0 : index
    %36 = vector.load %arg1[%c6_18, %c0_19, %c0_20] : memref<9x4x128xf32, #tpu.memory_space<vmem>>, vector<1x4x128xf32>
    %37 = vector.shape_cast %36 : vector<1x4x128xf32> to vector<4x128xf32>
    %38 = vector.broadcast %35 : f32 to vector<4x128xf32>
    %39 = arith.mulf %38, %37 : vector<4x128xf32>
    %40 = arith.addf %34, %39 : vector<4x128xf32>
    %c7 = arith.constant 7 : index
    %41 = memref.load %arg0[%c7] : memref<9xf32, #tpu.memory_space<smem>>
    %c7_21 = arith.constant 7 : index
    %c0_22 = arith.constant 0 : index
    %c0_23 = arith.constant 0 : index
    %42 = vector.load %arg1[%c7_21, %c0_22, %c0_23] : memref<9x4x128xf32, #tpu.memory_space<vmem>>, vector<1x4x128xf32>
    %43 = vector.shape_cast %42 : vector<1x4x128xf32> to vector<4x128xf32>
    %44 = vector.broadcast %41 : f32 to vector<4x128xf32>
    %45 = arith.mulf %44, %43 : vector<4x128xf32>
    %46 = arith.addf %40, %45 : vector<4x128xf32>
    %c8 = arith.constant 8 : index
    %47 = memref.load %arg0[%c8] : memref<9xf32, #tpu.memory_space<smem>>
    %c8_24 = arith.constant 8 : index
    %c0_25 = arith.constant 0 : index
    %c0_26 = arith.constant 0 : index
    %48 = vector.load %arg1[%c8_24, %c0_25, %c0_26] : memref<9x4x128xf32, #tpu.memory_space<vmem>>, vector<1x4x128xf32>
    %49 = vector.shape_cast %48 : vector<1x4x128xf32> to vector<4x128xf32>
    %50 = vector.broadcast %47 : f32 to vector<4x128xf32>
    %51 = arith.mulf %50, %49 : vector<4x128xf32>
    %52 = arith.addf %46, %51 : vector<4x128xf32>
    %c0_27 = arith.constant 0 : index
    %c0_28 = arith.constant 0 : index
    %53 = vector.load %arg2[%c0_27, %c0_28] : memref<4x128xf32, #tpu.memory_space<vmem>>, vector<4x128xf32>
    tpu.vector_store %arg2[%c0_27, %c0_28], %52 {strides = array<i32>} : memref<4x128xf32, #tpu.memory_space<vmem>>, vector<4x128xf32>,
    return
  }
}

</mosaic_0001>

<bundles_post_ra>
// kernel: tpu_custom_call.1
= control target key start
LH: loop header
LB: loop body
LE: loop exit
PB: predicated region body
PF: predicated region fallthrough
CT: control target
= control target key end

     0   :  { %7 = vsyncpa [#allocation5], 0  ;;  %s202_s0 = inlined_call_operand.hbm [shape: f32[9], index: 0, kind: input, shape index: {}]   ;;  %s203_s1 = inlined_call_operand.hbm [shape: f32[9,4,128], index: 1, kind: input, shape index: {}]   ;;  %s204_s2 = inlined_call_operand.hbm [shape: f32[4,128], index: 2, kind: output, shape index: {}]  }
   0x1   :  { %8 = vsyncpa [#allocation3], 0 }
   0x2   :  { %9 = vsyncpa [#allocation4], 0  ;;  %s173_s9 = smov [#allocation2]   ;;  %s174_s12 = smov [#allocation6]  }
   0x3   :  { %17 = dma.hbm_to_smem %s202_s0, 16, %s173_s9, [#allocation5]  }
   0x4   :  { %s23_s13 = sshll.u32 %s174_s12, 4  ;;  %s24_s13 = int_to_ptr.vmem [resolvable:$true] %s23_s13 }
   0x5   :  { %s135_s14 = scalar_lea.vmem %s24_s13, 576  ;;  %p140_p1 = scmp.lt.s32.totalorder %s24_s13, %s24_s13 }
   0x6   :  { %p136_p0 = scmp.ne.s32.totalorder %s24_s13, %s135_s14  ;;  %p141_p2 = scmp.lt.s32.totalorder %s135_s14, %s135_s14 }
   0x8   :  { %p142_p3 = por %p141_p2, %p140_p1 }
   0xa   :  { %p143_p4 = pnand %p142_p3, %p136_p0 }
   0xc   :  { %146 = shalt.err (!%p143_p4)
}
   0xd   :  { %s175_s15 = smov 64   ;;  %s176_s16 = smov 4  }
   0xe   :  { %29 = dma.hbm_to_vmem [thread:$0]  %s203_s1, 576, %s24_s13, [#allocation3], %s175_s15, %s175_s15, %s176_s16  }
   0xf   :  { %167 = dma.done.wait [#allocation5], 16  }
  0x10   :  { %168 = vsyncadd [#allocation5], 4294967280 }
  0x11   :  { %169 = dma.done.wait [#allocation3], 576  }
  0x12   :  { %170 = vsyncadd [#allocation3], 4294966720 }
  0x13   :  { %36 = sfence }
  0x14   :  { %s37_s0 = sld [smem:[#allocation2]]  ;;  %v38_v0 = vld [vmem:[#allocation6] sm:$0xf]  ;;  %v43_v1 = vld [vmem:[#allocation6 + $0x4] sm:$0xf]  ;;  %s177_s26 = smov [#allocation7]  }
  0x15   :  { %s106_s19 = sld [smem:[#allocation2 + $0x1]]  ;;  %v49_v3 = vld [vmem:[#allocation6 + $0x8] sm:$0xf]  ;;  %v55_v6 = vld [vmem:[#allocation6 + $0xc] sm:$0xf]  ;;  %s96_s27 = sshll.u32 %s177_s26, 4  ;;  %s97_s27 = int_to_ptr.vmem [resolvable:$true] %s96_s27 }
  0x16   :  { %s107_s20 = sld [smem:[#allocation2 + $0x2]]  ;;  %v61_v11 = vld [vmem:[#allocation6 + $0x10] sm:$0xf]  ;;  %v67_v15 = vld [vmem:[#allocation6 + $0x14] sm:$0xf]  ;;  %s147_s28 = scalar_lea.vmem %s97_s27, 64 }
  0x17   :  { %s108_s21 = sld [smem:[#allocation2 + $0x3]]  ;;  %v73_v19 = vld [vmem:[#allocation6 + $0x18] sm:$0xf]  ;;  %v79_v23 = vld [vmem:[#allocation6 + $0x1c] sm:$0xf]  ;;  %p148_p5 = scmp.ne.s32.totalorder %s97_s27, %s147_s28 }
  0x18   :  { %s109_s22 = sld [smem:[#allocation2 + $0x4]]  ;;  %v85_v27 = vld [vmem:[#allocation6 + $0x20] sm:$0xf]  ;;  %p152_p6 = scmp.lt.s32.totalorder %s97_s27, %s97_s27 }
  0x19   :  { %s110_s23 = sld [smem:[#allocation2 + $0x5]]  ;;  %p153_p7 = scmp.lt.s32.totalorder %s147_s28, %s147_s28 }
  0x1a   :  { %v39_v2 = vstv %s37_s0  ;;  %s111_s24 = sld [smem:[#allocation2 + $0x6]] }
  0x1b   :  { %v40_v4 = vmul.f32 %v39_v2, %v38_v0  ;;  %v44_v5 = vstv %s106_s19  ;;  %s112_s1 = sld [smem:[#allocation2 + $0x7]]  ;;  %p154_p8 = por %p153_p7, %p152_p6 }
  0x1c   :  { %v45_v7 = vmul.f32 %v44_v5, %v43_v1  ;;  %v50_v8 = vstv %s107_s20  ;;  %s113_s25 = sld [smem:[#allocation2 + $0x8]] }
  0x1d   :  { %v51_v9 = vmul.f32 %v50_v8, %v49_v3  ;;  %v56_v10 = vstv %s108_s21  ;;  %p155_p9 = pnand %p154_p8, %p148_p5 }
  0x1e   :  { %v46_v12 = vadd.f32 %v45_v7, %v40_v4  ;;  %v57_v13 = vmul.f32 %v56_v10, %v55_v6  ;;  %v62_v14 = vstv %s109_s22 }
  0x1f   :  { %v68_v16 = vstv %s110_s23  ;;  %v63_v18 = vmul.f32 %v62_v14, %v61_v11 }
  0x20   :  { %v52_v17 = vadd.f32 %v51_v9, %v46_v12  ;;  %v74_v20 = vstv %s111_s24  ;;  %v69_v22 = vmul.f32 %v68_v16, %v67_v15 }
  0x21   :  { %v80_v24 = vstv %s112_s1  ;;  %v75_v26 = vmul.f32 %v74_v20, %v73_v19 }
  0x22   :  { %v58_v21 = vadd.f32 %v57_v13, %v52_v17  ;;  %v86_v28 = vstv %s113_s25  ;;  %v81_v30 = vmul.f32 %v80_v24, %v79_v23 }
  0x23   :  { %v87_v32 = vmul.f32 %v86_v28, %v85_v27 }
  0x24   :  { %v64_v25 = vadd.f32 %v63_v18, %v58_v21 }
  0x26   :  { %v70_v29 = vadd.f32 %v69_v22, %v64_v25 }
  0x28   :  { %v76_v31 = vadd.f32 %v75_v26, %v70_v29 }
  0x2a   :  { %v82_v33 = vadd.f32 %v81_v30, %v76_v31 }
  0x2c   :  { %v88_v34 = vadd.f32 %v87_v32, %v82_v33 }
  0x2e   :  { %89 = vst [vmem:[#allocation7] sm:$0xf] %v88_v34 }
  0x2f   :  { %158 = shalt.err (!%p155_p9)
}
  0x30   :  { %99 = dma.vmem_to_hbm [thread:$0]  %s97_s27, 64, %s204_s2, [#allocation4]  }
  0x31   :  { %171 = dma.done.wait [#allocation4], 64  }
  0x32   :  { %172 = vsyncadd [#allocation4], 4294967232 }
  0x33   :  { %103 = vsyncpa [#allocation3], 1 }
  0x34   :  { %104 = vsyncpa [#allocation4], 1 }
  0x35   :  { %105 = vsyncpa [#allocation5], 1 }

</bundles_post_ra>
